<compile_context>
chip_gen: v6e
topology: v6e:2x2x1
jax: 0.10.0
libtpu: 0.0.40
codegen_flags: <defaults>
</compile_context>

<pallas_src>
import functools

import jax
import jax.numpy as jnp
from jax.experimental import pallas as pl
from jax.experimental.pallas import tpu as pltpu

_LANE = 128
_NEG_BIG = -1e30  # bias for padded class columns; exp() underflows to exactly 0


def _round_up(x, m):
    return (x + m - 1) // m * m


def _gcn_layer_kernel(a_ref, x_ref, dcol_ref, drow_ref, w_ref, b_ref,
                      o_ref, acc_ref, *, last_layer):
    """One tile-step of a GCN layer.

    acc[i] += A'[i, k] @ (D^{-1/2}[k] * (X[k] @ W))        (bf16 MXU, f32 accumulate)

    On the last reduction step: apply the row-side D^{-1/2}, add bias, then either
    ReLU (hidden layer) or log_softmax over the lane-dense padded class axis.
    """
    k = pl.program_id(1)

    @pl.when(k == 0)
    def _init():
        acc_ref[...] = jnp.zeros_like(acc_ref)

    # Small matmul: (tk, F) @ (F, HP) -> (tk, HP), f32 accumulation on the MXU.
    xw = jnp.dot(x_ref[...], w_ref[...], preferred_element_type=jnp.float32)
    # Column-side normalization (folded into the kernel; no dense A_hat in HBM).
    xw = xw * dcol_ref[...]
    # Dominant matmul: (tm, tk) bf16 @ (tk, HP) bf16 -> f32.
    acc_ref[...] += jnp.dot(a_ref[...], xw.astype(jnp.bfloat16),
                            preferred_element_type=jnp.float32)

    @pl.when(k == pl.num_programs(1) - 1)
    def _finalize():
        z = acc_ref[...] * drow_ref[...] + b_ref[...]      # row-side D^{-1/2} + bias, f32
        if last_layer:
            # log_softmax over 128 lanes; padded classes carry a -1e30 bias -> exp == 0.
            m = jnp.max(z, axis=1, keepdims=True)
            lse = m + jnp.log(jnp.sum(jnp.exp(z - m), axis=1, keepdims=True))
            o_ref[...] = (z - lse).astype(o_ref.dtype)
        else:
            o_ref[...] = jnp.maximum(z, 0.0).astype(o_ref.dtype)


def _gcn_layer(a_prime, x, dinv, w, b, *, tm, tk, last_layer, out_dtype):
    np_ = a_prime.shape[0]
    f = x.shape[1]
    hp = w.shape[1]
    grid = (np_ // tm, np_ // tk)

    kernel = functools.partial(_gcn_layer_kernel, last_layer=last_layer)

    flops = 2 * np_ * np_ * hp + 2 * np_ * f * hp * grid[0]
    transcendentals = (np_ * hp + np_) if last_layer else 0
    bytes_accessed = (np_ * np_ * 2            # A' bf16
                      + grid[0] * np_ * f * 2  # X / H tiles (re-read per row tile)
                      + np_ * hp * 4           # output
                      + np_ * 4 * (grid[0] + grid[1]))  # dinv

    return pl.pallas_call(
        kernel,
        out_shape=jax.ShapeDtypeStruct((np_, hp), out_dtype),
        grid_spec=pltpu.PrefetchScalarGridSpec(
            num_scalar_prefetch=0,
            grid=grid,
            in_specs=[
                pl.BlockSpec((tm, tk), lambda i, k: (i, k)),   # A' tile (bf16)
                pl.BlockSpec((tk, f), lambda i, k: (k, 0)),    # X / H rows (column tile)
                pl.BlockSpec((tk, 1), lambda i, k: (k, 0)),    # D^{-1/2}, column side
                pl.BlockSpec((tm, 1), lambda i, k: (i, 0)),    # D^{-1/2}, row side
                pl.BlockSpec((f, hp), lambda i, k: (0, 0)),    # W (lane-padded, bf16)
                pl.BlockSpec((1, hp), lambda i, k: (0, 0)),    # bias (lane-padded, f32)
            ],
            out_specs=pl.BlockSpec((tm, hp), lambda i, k: (i, 0)),
            scratch_shapes=[pltpu.VMEM((tm, hp), jnp.float32)],
        ),
        compiler_params=pltpu.CompilerParams(
            dimension_semantics=("parallel", "arbitrary"),
            vmem_limit_bytes=64 * 1024 * 1024,
        ),
        cost_estimate=pl.CostEstimate(
            flops=flops,
            transcendentals=transcendentals,
            bytes_accessed=bytes_accessed,
        ),
    )(a_prime, x, dinv, dinv, w, b)


@jax.jit
def gnn_forward(x, edge_index, w1, b1, w2, b2):
    """x: [N, F] float32 node features; edge_index: [2, E] int32."""
    n, f = x.shape
    hid = w1.shape[1]
    c = w2.shape[1]

    # ---- tiling / padding choices ------------------------------------------------
    tile = 256 if n > 256 else 128         # row + reduction tile (sized well under VMEM)
    np_ = _round_up(n, tile)
    hp = _round_up(hid, _LANE)             # hidden axis padded to lane width
    cp = _round_up(c, _LANE)               # class axis padded to lane width

    # ---- glue (plain JAX): 0/1 adjacency + self loops, degree rsqrt ---------------
    src = edge_index[0].astype(jnp.int32)
    dst = edge_index[1].astype(jnp.int32)
    adj = jnp.zeros((np_, np_), jnp.float32).at[dst, src].add(1.0)
    adj = jnp.minimum(adj, 1.0)                       # dedup duplicate edges
    deg = jnp.sum(adj, axis=1) + 1.0                  # degree of A + I (>= 1)
    a_prime = (adj + jnp.eye(np_, dtype=jnp.float32)).astype(jnp.bfloat16)  # 0/1: exact
    dinv = jax.lax.rsqrt(deg).reshape(np_, 1)         # D^{-1/2}, applied in-kernel

    # ---- lane-pad operands (zero hidden pads; -1e30 bias on padded classes) -------
    x_p = jnp.zeros((np_, f), jnp.bfloat16).at[:n, :].set(x.astype(jnp.bfloat16))
    w1_p = jnp.zeros((f, hp), jnp.bfloat16).at[:, :hid].set(w1.astype(jnp.bfloat16))
    b1_p = jnp.zeros((1, hp), jnp.float32).at[0, :hid].set(b1)
    w2_p = jnp.zeros((hp, cp), jnp.bfloat16).at[:hid, :c].set(w2.astype(jnp.bfloat16))
    b2_p = jnp.full((1, cp), _NEG_BIG, jnp.float32).at[0, :c].set(b2)

    # ---- layer 1: GCNConv + ReLU, layer 2: GCNConv + log_softmax ------------------
    h = _gcn_layer(a_prime, x_p, dinv, w1_p, b1_p,
                   tm=tile, tk=tile, last_layer=False, out_dtype=jnp.bfloat16)
    z = _gcn_layer(a_prime, h, dinv, w2_p, b2_p,
                   tm=tile, tk=tile, last_layer=True, out_dtype=jnp.float32)
    return z[:n, :c]


def _reference(x, edge_index, w1, b1, w2, b2):
    n = x.shape[0]
    src, dst = edge_index[0], edge_index[1]
    adj = jnp.zeros((n, n), jnp.float32).at[dst, src].add(1.0)
    adj = jnp.minimum(adj, 1.0) + jnp.eye(n, dtype=jnp.float32)
    deg = jnp.sum(adj, axis=1)
    dinv = jnp.where(deg > 0, jax.lax.rsqrt(deg), 0.0)
    a_hat = adj * dinv[:, None] * dinv[None, :]
    h = jnp.maximum(a_hat @ (x @ w1) + b1, 0.0)
    z = a_hat @ (h @ w2) + b2
    return jax.nn.log_softmax(z, axis=1)


if __name__ == "__main__":
    # Small shapes consistent with the module:
    #   N nodes = 16, input_features = 8, hidden_features = 16, output_classes = 4
    N, F_IN, HID, C = 16, 8, 16, 4

    key = jax.random.PRNGKey(0)
    k_x, k_e, k_w1, k_w2 = jax.random.split(key, 4)

    x = jax.random.normal(k_x, (N, F_IN), dtype=jnp.float32)

    # Deterministic small graph: ring edges (both directions) + a few random edges.
    idx = jnp.arange(N, dtype=jnp.int32)
    ring_src = jnp.concatenate([idx, (idx + 1) % N])
    ring_dst = jnp.concatenate([(idx + 1) % N, idx])
    rand_src = jax.random.randint(k_e, (8,), 0, N, dtype=jnp.int32)
    rand_dst = (rand_src + 5) % N
    edge_index = jnp.stack(
        [jnp.concatenate([ring_src, rand_src]), jnp.concatenate([ring_dst, rand_dst])]
    )

    # Deterministic glorot-ish weights, zero biases (GCNConv default bias init is zeros).
    w1 = jax.random.normal(k_w1, (F_IN, HID), dtype=jnp.float32) * (2.0 / (F_IN + HID)) ** 0.5
    b1 = jnp.zeros((HID,), jnp.float32)
    w2 = jax.random.normal(k_w2, (HID, C), dtype=jnp.float32) * (2.0 / (HID + C)) ** 0.5
    b2 = jnp.zeros((C,), jnp.float32)

    out = gnn_forward(x, edge_index, w1, b1, w2, b2)
    out = jax.block_until_ready(out)

    ref = _reference(x, edge_index, w1, b1, w2, b2)
    assert out.shape == (N, C)
    # bf16 MXU inputs with f32 accumulation -> compare against the f32 reference with a
    # bf16-appropriate tolerance; also check the rows are valid log-probabilities.
    assert jnp.all(jnp.isfinite(out)), "non-finite outputs"
    assert jnp.allclose(jnp.sum(jnp.exp(out), axis=1), 1.0, atol=1e-2), "rows not normalized"
    assert jnp.allclose(out, ref, atol=5e-2, rtol=5e-2), "mismatch vs reference"

    print("KERNEL_OK")
</pallas_src>

<mosaic_0001>
module attributes {stable_mosaic.version = 11 : i64} {
  func.func private @main(%arg0: i32) attributes {dimension_semantics = [#tpu.dimension_semantics<core_parallel>], iteration_bounds = array<i64: 2>, tpu.core_type = #tpu.core_type<sc_scalar_subcore>, window_params = []} {
    return
  }
}

module attributes {stable_mosaic.version = 11 : i64} {
  func.func private @main(%arg0: i32) attributes {dimension_semantics = [#tpu.dimension_semantics<core_parallel>], iteration_bounds = array<i64: 2>, tpu.core_type = #tpu.core_type<sc_scalar_subcore>, window_params = []} {
    return
  }
}

module attributes {stable_mosaic.version = 11 : i64} {
  func.func @_gcn_layer_kernel(%arg0: i32, %arg1: i32, %arg2: memref<128x128xbf16, #tpu.memory_space<vmem>>, %arg3: memref<128x8xbf16, #tpu.memory_space<vmem>>, %arg4: memref<128x1xf32, #tpu.memory_space<vmem>>, %arg5: memref<128x1xf32, #tpu.memory_space<vmem>>, %arg6: memref<8x128xbf16, #tpu.memory_space<vmem>>, %arg7: memref<1x128xf32, #tpu.memory_space<vmem>>, %arg8: memref<128x128xbf16, #tpu.memory_space<vmem>>, %arg9: memref<128x128xf32, #tpu.memory_space<vmem>>) attributes {dimension_semantics = [#tpu.dimension_semantics<parallel>, #tpu.dimension_semantics<arbitrary>], iteration_bounds = array<i64: 1, 1>, scalar_prefetch = 0 : i64, scratch_operands = 1 : i64, tpu.core_type = #tpu.core_type<tc>, window_params = [{transform_indices = @transform_0, window_bounds = array<i64: 128, 128>}, {transform_indices = @transform_1, window_bounds = array<i64: 128, 8>}, {transform_indices = @transform_2, window_bounds = array<i64: 128, 1>}, {transform_indices = @transform_3, window_bounds = array<i64: 128, 1>}, {pipeline_mode = #tpu.pipeline_mode<synchronous>, transform_indices = @transform_4, window_bounds = array<i64: 8, 128>}, {pipeline_mode = #tpu.pipeline_mode<synchronous>, transform_indices = @transform_5, window_bounds = array<i64: 1, 128>}, {transform_indices = @transform_6, window_bounds = array<i64: 128, 128>}]} {
    %c0_i32 = arith.constant 0 : i32
    %0 = arith.cmpi eq, %arg1, %c0_i32 : i32
    %1 = arith.extui %0 : i1 to i32
    %c0_i32_0 = arith.constant 0 : i32
    %2 = arith.cmpi ne, %1, %c0_i32_0 : i32
    scf.if %2 {
      %cst_15 = arith.constant 0.000000e+00 : f32
      %18 = vector.broadcast %cst_15 : f32 to vector<128x128xf32>
      %c0_16 = arith.constant 0 : index
      %c0_17 = arith.constant 0 : index
      %19 = vector.load %arg9[%c0_16, %c0_17] : memref<128x128xf32, #tpu.memory_space<vmem>>, vector<128x128xf32>
      tpu.vector_store %arg9[%c0_16, %c0_17], %18 {strides = array<i32>} : memref<128x128xf32, #tpu.memory_space<vmem>>, vector<128x128xf32>,
    } else {
    }
    %c0 = arith.constant 0 : index
    %c0_1 = arith.constant 0 : index
    %3 = vector.load %arg3[%c0, %c0_1] : memref<128x8xbf16, #tpu.memory_space<vmem>>, vector<128x8xbf16>
    %c0_2 = arith.constant 0 : index
    %c0_3 = arith.constant 0 : index
    %4 = vector.load %arg6[%c0_2, %c0_3] : memref<8x128xbf16, #tpu.memory_space<vmem>>, vector<8x128xbf16>
    %cst = arith.constant dense<0.000000e+00> : vector<128x128xf32>
    %5 = tpu.matmul %3, %4, %cst {dimension_numbers = #tpu.dot_dimension_numbers<[1], [0], [0], [1], [0, 0, 1, 1], [], []>} : vector<128x8xbf16>, vector<8x128xbf16>, vector<128x128xf32> -> vector<128x128xf32>
    %c0_4 = arith.constant 0 : index
    %c0_5 = arith.constant 0 : index
    %6 = vector.load %arg4[%c0_4, %c0_5] : memref<128x1xf32, #tpu.memory_space<vmem>>, vector<128x1xf32>
    %7 = vector.broadcast %6 : vector<128x1xf32> to vector<128x128xf32>
    %8 = arith.mulf %5, %7 : vector<128x128xf32>
    %c0_6 = arith.constant 0 : index
    %c0_7 = arith.constant 0 : index
    %9 = vector.load %arg9[%c0_6, %c0_7] : memref<128x128xf32, #tpu.memory_space<vmem>>, vector<128x128xf32>
    %c0_8 = arith.constant 0 : index
    %c0_9 = arith.constant 0 : index
    %10 = vector.load %arg2[%c0_8, %c0_9] : memref<128x128xbf16, #tpu.memory_space<vmem>>, vector<128x128xbf16>
    %11 = arith.truncf %8 : vector<128x128xf32> to vector<128x128xbf16>
    %cst_10 = arith.constant dense<0.000000e+00> : vector<128x128xf32>
    %12 = tpu.matmul %10, %11, %cst_10 {dimension_numbers = #tpu.dot_dimension_numbers<[1], [0], [0], [1], [0, 0, 1, 1], [], []>} : vector<128x128xbf16>, vector<128x128xbf16>, vector<128x128xf32> -> vector<128x128xf32>
    %13 = arith.addf %9, %12 : vector<128x128xf32>
    %c0_11 = arith.constant 0 : index
    %c0_12 = arith.constant 0 : index
    %14 = vector.load %arg9[%c0_11, %c0_12] : memref<128x128xf32, #tpu.memory_space<vmem>>, vector<128x128xf32>
    tpu.vector_store %arg9[%c0_11, %c0_12], %13 {strides = array<i32>} : memref<128x128xf32, #tpu.memory_space<vmem>>, vector<128x128xf32>,
    %c0_i32_13 = arith.constant 0 : i32
    %15 = arith.cmpi eq, %arg1, %c0_i32_13 : i32
    %16 = arith.extui %15 : i1 to i32
    %c0_i32_14 = arith.constant 0 : i32
    %17 = arith.cmpi ne, %16, %c0_i32_14 : i32
    scf.if %17 {
      %c0_15 = arith.constant 0 : index
      %c0_16 = arith.constant 0 : index
      %18 = vector.load %arg9[%c0_15, %c0_16] : memref<128x128xf32, #tpu.memory_space<vmem>>, vector<128x128xf32>
      %c0_17 = arith.constant 0 : index
      %c0_18 = arith.constant 0 : index
      %19 = vector.load %arg5[%c0_17, %c0_18] : memref<128x1xf32, #tpu.memory_space<vmem>>, vector<128x1xf32>
      %20 = vector.broadcast %19 : vector<128x1xf32> to vector<128x128xf32>
      %21 = arith.mulf %18, %20 : vector<128x128xf32>
      %c0_19 = arith.constant 0 : index
      %c0_20 = arith.constant 0 : index
      %22 = vector.load %arg7[%c0_19, %c0_20] : memref<1x128xf32, #tpu.memory_space<vmem>>, vector<1x128xf32>
      %23 = vector.broadcast %22 : vector<1x128xf32> to vector<128x128xf32>
      %24 = arith.addf %21, %23 : vector<128x128xf32>
      %cst_21 = arith.constant 0.000000e+00 : f32
      %25 = vector.broadcast %cst_21 : f32 to vector<128x128xf32>
      %26 = arith.maximumf %24, %25 : vector<128x128xf32>
      %27 = arith.truncf %26 : vector<128x128xf32> to vector<128x128xbf16>
      %c0_22 = arith.constant 0 : index
      %c0_23 = arith.constant 0 : index
      %28 = vector.load %arg8[%c0_22, %c0_23] : memref<128x128xbf16, #tpu.memory_space<vmem>>, vector<128x128xbf16>
      tpu.vector_store %arg8[%c0_22, %c0_23], %27 {strides = array<i32>} : memref<128x128xbf16, #tpu.memory_space<vmem>>, vector<128x128xbf16>,
    } else {
    }
    return
  }
  func.func @transform_0(%arg0: i32, %arg1: i32) -> (i32, i32) {
    %c0_i32 = arith.constant 0 : i32
    return %arg0, %arg1 : i32, i32
  }
  func.func @transform_1(%arg0: i32, %arg1: i32) -> (i32, i32) {
    %c0_i32 = arith.constant 0 : i32
    %c0_i32_0 = arith.constant 0 : i32
    return %arg1, %c0_i32 : i32, i32
  }
  func.func @transform_2(%arg0: i32, %arg1: i32) -> (i32, i32) {
    %c0_i32 = arith.constant 0 : i32
    %c0_i32_0 = arith.constant 0 : i32
    return %arg1, %c0_i32 : i32, i32
  }
  func.func @transform_3(%arg0: i32, %arg1: i32) -> (i32, i32) {
    %c0_i32 = arith.constant 0 : i32
    %c0_i32_0 = arith.constant 0 : i32
    return %arg0, %c0_i32 : i32, i32
  }
  func.func @transform_4(%arg0: i32, %arg1: i32) -> (i32, i32) {
    %c0_i32 = arith.constant 0 : i32
    %c0_i32_0 = arith.constant 0 : i32
    %c0_i32_1 = arith.constant 0 : i32
    return %c0_i32, %c0_i32_0 : i32, i32
  }
  func.func @transform_5(%arg0: i32, %arg1: i32) -> (i32, i32) {
    %c0_i32 = arith.constant 0 : i32
    %c0_i32_0 = arith.constant 0 : i32
    %c0_i32_1 = arith.constant 0 : i32
    return %c0_i32, %c0_i32_0 : i32, i32
  }
  func.func @transform_6(%arg0: i32, %arg1: i32) -> (i32, i32) {
    %c0_i32 = arith.constant 0 : i32
    %c0_i32_0 = arith.constant 0 : i32
    return %arg0, %c0_i32 : i32, i32
  }
}

module attributes {stable_mosaic.version = 11 : i64} {
  func.func @_gcn_layer_kernel(%arg0: i32, %arg1: i32, %arg2: memref<128x128xbf16, #tpu.memory_space<vmem>>, %arg3: memref<128x128xbf16, #tpu.memory_space<vmem>>, %arg4: memref<128x1xf32, #tpu.memory_space<vmem>>, %arg5: memref<128x1xf32, #tpu.memory_space<vmem>>, %arg6: memref<128x128xbf16, #tpu.memory_space<vmem>>, %arg7: memref<1x128xf32, #tpu.memory_space<vmem>>, %arg8: memref<128x128xf32, #tpu.memory_space<vmem>>, %arg9: memref<128x128xf32, #tpu.memory_space<vmem>>) attributes {dimension_semantics = [#tpu.dimension_semantics<parallel>, #tpu.dimension_semantics<arbitrary>], iteration_bounds = array<i64: 1, 1>, scalar_prefetch = 0 : i64, scratch_operands = 1 : i64, tpu.core_type = #tpu.core_type<tc>, window_params = [{transform_indices = @transform_0, window_bounds = array<i64: 128, 128>}, {transform_indices = @transform_1, window_bounds = array<i64: 128, 128>}, {transform_indices = @transform_2, window_bounds = array<i64: 128, 1>}, {transform_indices = @transform_3, window_bounds = array<i64: 128, 1>}, {pipeline_mode = #tpu.pipeline_mode<synchronous>, transform_indices = @transform_4, window_bounds = array<i64: 128, 128>}, {pipeline_mode = #tpu.pipeline_mode<synchronous>, transform_indices = @transform_5, window_bounds = array<i64: 1, 128>}, {transform_indices = @transform_6, window_bounds = array<i64: 128, 128>}]} {
    %c0_i32 = arith.constant 0 : i32
    %0 = arith.cmpi eq, %arg1, %c0_i32 : i32
    %1 = arith.extui %0 : i1 to i32
    %c0_i32_0 = arith.constant 0 : i32
    %2 = arith.cmpi ne, %1, %c0_i32_0 : i32
    scf.if %2 {
      %cst_15 = arith.constant 0.000000e+00 : f32
      %18 = vector.broadcast %cst_15 : f32 to vector<128x128xf32>
      %c0_16 = arith.constant 0 : index
      %c0_17 = arith.constant 0 : index
      %19 = vector.load %arg9[%c0_16, %c0_17] : memref<128x128xf32, #tpu.memory_space<vmem>>, vector<128x128xf32>
      tpu.vector_store %arg9[%c0_16, %c0_17], %18 {strides = array<i32>} : memref<128x128xf32, #tpu.memory_space<vmem>>, vector<128x128xf32>,
    } else {
    }
    %c0 = arith.constant 0 : index
    %c0_1 = arith.constant 0 : index
    %3 = vector.load %arg3[%c0, %c0_1] : memref<128x128xbf16, #tpu.memory_space<vmem>>, vector<128x128xbf16>
    %c0_2 = arith.constant 0 : index
    %c0_3 = arith.constant 0 : index
    %4 = vector.load %arg6[%c0_2, %c0_3] : memref<128x128xbf16, #tpu.memory_space<vmem>>, vector<128x128xbf16>
    %cst = arith.constant dense<0.000000e+00> : vector<128x128xf32>
    %5 = tpu.matmul %3, %4, %cst {dimension_numbers = #tpu.dot_dimension_numbers<[1], [0], [0], [1], [0, 0, 1, 1], [], []>} : vector<128x128xbf16>, vector<128x128xbf16>, vector<128x128xf32> -> vector<128x128xf32>
    %c0_4 = arith.constant 0 : index
    %c0_5 = arith.constant 0 : index
    %6 = vector.load %arg4[%c0_4, %c0_5] : memref<128x1xf32, #tpu.memory_space<vmem>>, vector<128x1xf32>
    %7 = vector.broadcast %6 : vector<128x1xf32> to vector<128x128xf32>
    %8 = arith.mulf %5, %7 : vector<128x128xf32>
    %c0_6 = arith.constant 0 : index
    %c0_7 = arith.constant 0 : index
    %9 = vector.load %arg9[%c0_6, %c0_7] : memref<128x128xf32, #tpu.memory_space<vmem>>, vector<128x128xf32>
    %c0_8 = arith.constant 0 : index
    %c0_9 = arith.constant 0 : index
    %10 = vector.load %arg2[%c0_8, %c0_9] : memref<128x128xbf16, #tpu.memory_space<vmem>>, vector<128x128xbf16>
    %11 = arith.truncf %8 : vector<128x128xf32> to vector<128x128xbf16>
    %cst_10 = arith.constant dense<0.000000e+00> : vector<128x128xf32>
    %12 = tpu.matmul %10, %11, %cst_10 {dimension_numbers = #tpu.dot_dimension_numbers<[1], [0], [0], [1], [0, 0, 1, 1], [], []>} : vector<128x128xbf16>, vector<128x128xbf16>, vector<128x128xf32> -> vector<128x128xf32>
    %13 = arith.addf %9, %12 : vector<128x128xf32>
    %c0_11 = arith.constant 0 : index
    %c0_12 = arith.constant 0 : index
    %14 = vector.load %arg9[%c0_11, %c0_12] : memref<128x128xf32, #tpu.memory_space<vmem>>, vector<128x128xf32>
    tpu.vector_store %arg9[%c0_11, %c0_12], %13 {strides = array<i32>} : memref<128x128xf32, #tpu.memory_space<vmem>>, vector<128x128xf32>,
    %c0_i32_13 = arith.constant 0 : i32
    %15 = arith.cmpi eq, %arg1, %c0_i32_13 : i32
    %16 = arith.extui %15 : i1 to i32
    %c0_i32_14 = arith.constant 0 : i32
    %17 = arith.cmpi ne, %16, %c0_i32_14 : i32
    scf.if %17 {
      %c0_15 = arith.constant 0 : index
      %c0_16 = arith.constant 0 : index
      %18 = vector.load %arg9[%c0_15, %c0_16] : memref<128x128xf32, #tpu.memory_space<vmem>>, vector<128x128xf32>
      %c0_17 = arith.constant 0 : index
      %c0_18 = arith.constant 0 : index
      %19 = vector.load %arg5[%c0_17, %c0_18] : memref<128x1xf32, #tpu.memory_space<vmem>>, vector<128x1xf32>
      %20 = vector.broadcast %19 : vector<128x1xf32> to vector<128x128xf32>
      %21 = arith.mulf %18, %20 : vector<128x128xf32>
      %c0_19 = arith.constant 0 : index
      %c0_20 = arith.constant 0 : index
      %22 = vector.load %arg7[%c0_19, %c0_20] : memref<1x128xf32, #tpu.memory_space<vmem>>, vector<1x128xf32>
      %23 = vector.broadcast %22 : vector<1x128xf32> to vector<128x128xf32>
      %24 = arith.addf %21, %23 : vector<128x128xf32>
      %cst_21 = arith.constant dense<0xFF800000> : vector<128xf32>
      %25 = vector.multi_reduction <maximumf>, %24, %cst_21 [1] : vector<128x128xf32> to vector<128xf32>
      %26 = vector.shape_cast %25 : vector<128xf32> to vector<128x1xf32>
      %27 = vector.broadcast %26 : vector<128x1xf32> to vector<128x128xf32>
      %28 = arith.subf %24, %27 : vector<128x128xf32>
      %29 = math.exp %28 : vector<128x128xf32>
      %cst_22 = arith.constant dense<0.000000e+00> : vector<128xf32>
      %30 = vector.multi_reduction <add>, %29, %cst_22 [1] : vector<128x128xf32> to vector<128xf32>
      %31 = vector.shape_cast %30 : vector<128xf32> to vector<128x1xf32>
      %32 = math.log %31 : vector<128x1xf32>
      %33 = arith.addf %26, %32 : vector<128x1xf32>
      %34 = vector.broadcast %33 : vector<128x1xf32> to vector<128x128xf32>
      %35 = arith.subf %24, %34 : vector<128x128xf32>
      %c0_23 = arith.constant 0 : index
      %c0_24 = arith.constant 0 : index
      %36 = vector.load %arg8[%c0_23, %c0_24] : memref<128x128xf32, #tpu.memory_space<vmem>>, vector<128x128xf32>
      tpu.vector_store %arg8[%c0_23, %c0_24], %35 {strides = array<i32>} : memref<128x128xf32, #tpu.memory_space<vmem>>, vector<128x128xf32>,
    } else {
    }
    return
  }
  func.func @transform_0(%arg0: i32, %arg1: i32) -> (i32, i32) {
    %c0_i32 = arith.constant 0 : i32
    return %arg0, %arg1 : i32, i32
  }
  func.func @transform_1(%arg0: i32, %arg1: i32) -> (i32, i32) {
    %c0_i32 = arith.constant 0 : i32
    %c0_i32_0 = arith.constant 0 : i32
    return %arg1, %c0_i32 : i32, i32
  }
  func.func @transform_2(%arg0: i32, %arg1: i32) -> (i32, i32) {
    %c0_i32 = arith.constant 0 : i32
    %c0_i32_0 = arith.constant 0 : i32
    return %arg1, %c0_i32 : i32, i32
  }
  func.func @transform_3(%arg0: i32, %arg1: i32) -> (i32, i32) {
    %c0_i32 = arith.constant 0 : i32
    %c0_i32_0 = arith.constant 0 : i32
    return %arg0, %c0_i32 : i32, i32
  }
  func.func @transform_4(%arg0: i32, %arg1: i32) -> (i32, i32) {
    %c0_i32 = arith.constant 0 : i32
    %c0_i32_0 = arith.constant 0 : i32
    %c0_i32_1 = arith.constant 0 : i32
    return %c0_i32, %c0_i32_0 : i32, i32
  }
  func.func @transform_5(%arg0: i32, %arg1: i32) -> (i32, i32) {
    %c0_i32 = arith.constant 0 : i32
    %c0_i32_0 = arith.constant 0 : i32
    %c0_i32_1 = arith.constant 0 : i32
    return %c0_i32, %c0_i32_0 : i32, i32
  }
  func.func @transform_6(%arg0: i32, %arg1: i32) -> (i32, i32) {
    %c0_i32 = arith.constant 0 : i32
    %c0_i32_0 = arith.constant 0 : i32
    return %arg0, %c0_i32 : i32, i32
  }
}

</mosaic_0001>

<bundles_post_ra>
// kernel: gnn_forward.2
= control target key start
LH: loop header
LB: loop body
LE: loop exit
PB: predicated region body
PF: predicated region fallthrough
CT: control target
= control target key end

     0   :  { %vm126_vm0 = vcmask 1043456   ;;  %vm101_vm1 = vcmask 64512   ;;  %v1025_v1 = vmov 0   ;;  %s1273_s4 = inlined_call_operand.vmem [shape: bf16[8,128], index: 4, kind: input, shape index: {}]   ;;  %s1274_s1 = inlined_call_operand.vmem [shape: bf16[128,8], index: 1, kind: input, shape index: {}]   ;;  %s1275_s2 = inlined_call_operand.vmem [shape: f32[128,1], index: 2, kind: input, shape index: {}, may-alias: {2,3}]   ;;  %s1276_s3 = inlined_call_operand.vmem [shape: f32[128,1], index: 3, kind: input, shape index: {}, may-alias: {2,3}]   ;;  %s1277_s0 = inlined_call_operand.vmem [shape: bf16[128,128], index: 0, kind: input, shape index: {}]   ;;  %s1278_s5 = inlined_call_operand.vmem [shape: f32[1,128], index: 5, kind: input, shape index: {}]   ;;  %s1279_s6 = inlined_call_operand.vmem [shape: bf16[128,128], index: 6, kind: output, shape index: {}]  }
   0x1   :  { %v60_v0 = vld [vmem:[%s1273_s4] sm:$0xf]  ;;  %1007 = vset.pattern.permute.xlu0 %v1025_v1  ;;  %1008 = vset.pattern.permute.xlu1 %v1025_v1  ;;  %v1010_v4 = vld [vmem:[%s1274_s1 + $0x8] sm:$0xff]   ;;  %v1011_v5 = vld [vmem:[%s1274_s1 + $0x10] sm:$0xff]  }
   0x2   :  { %1005 = vmatprep.subr.msk.bf16.mxu0 %vm126_vm0, %v60_v0  ;;  %v128_v2 = vsel %vm126_vm0, %v60_v0, 0  ;;  %v1009_v3 = vld [vmem:[%s1274_s1] sm:$0xff]   ;;  %v241_v6 = vld [vmem:[%s1275_s2 + $0x70] sm:$0xff]  ;;  %v1012_v7 = vld [vmem:[%s1274_s1 + $0x18] sm:$0xff]  }
   0x3   :  { %940 = vmatpush3.bf16.msra.mxu0 %v128_v2  ;;  %941 = vmatprep.mubr.msk.bf16.mxu0 %vm101_vm1, %v1009_v3  ;;  %v239_v8 = vld [vmem:[%s1275_s2 + $0x60] sm:$0xff]  ;;  %v242_v10 = vld [vmem:[%s1275_s2 + $0x78] sm:$0xff]  ;;  %v240_v11 = vld [vmem:[%s1275_s2 + $0x68] sm:$0xff] }
   0x4   :  { %315 = vperm.xlu0 %1007, %v241_v6   ;;  %v1013_v9 = vld [vmem:[%s1274_s1 + $0x20] sm:$0xff]   ;;  %305 = vperm.xlu1 %1008, %v239_v8   ;;  %v237_v12 = vld [vmem:[%s1275_s2 + $0x50] sm:$0xff]  ;;  %v238_v13 = vld [vmem:[%s1275_s2 + $0x58] sm:$0xff] }
   0x5   :  { %v1014_v14 = vld [vmem:[%s1274_s1 + $0x28] sm:$0xff]   ;;  %v1015_v15 = vld [vmem:[%s1274_s1 + $0x30] sm:$0xff]   ;;  %v235_v16 = vld [vmem:[%s1275_s2 + $0x40] sm:$0xff] }
   0x6   :  { %942 = vmatmul.mubr.msk.bf16.vlgmr.msra.gmra.mxu0 %vm101_vm1, %v1010_v4  ;;  %v236_v17 = vld [vmem:[%s1275_s2 + $0x48] sm:$0xff]  ;;  %v233_v18 = vld [vmem:[%s1275_s2 + $0x30] sm:$0xff]  ;;  %v234_v19 = vld [vmem:[%s1275_s2 + $0x38] sm:$0xff] }
   0x7   :  { %945 = vmatprep.mubr.msk.bf16.mxu0 %vm101_vm1, %v1011_v5  ;;  %v1016_v20 = vld [vmem:[%s1274_s1 + $0x38] sm:$0xff]   ;;  %v231_v21 = vld [vmem:[%s1275_s2 + $0x20] sm:$0xff]  ;;  %v232_v22 = vld [vmem:[%s1275_s2 + $0x28] sm:$0xff] }
   0x8   :  { %320 = vperm.xlu0 %1007, %v242_v10   ;;  %310 = vperm.xlu1 %1008, %v240_v11   ;;  %v229_v23 = vld [vmem:[%s1275_s2 + $0x10] sm:$0xff]  ;;  %v230_v24 = vld [vmem:[%s1275_s2 + $0x18] sm:$0xff]  ;;  %v227_v25 = vld [vmem:[%s1275_s2] sm:$0xff] }
   0x9   :  { %v228_v26 = vld [vmem:[%s1275_s2 + $0x8] sm:$0xff]  ;;  %v575_v27 = vld [vmem:[%s1276_s3] sm:$0xff]  ;;  %v577_v29 = vld [vmem:[%s1276_s3 + $0x10] sm:$0xff] }
   0xa   :  { %v576_v28 = vld [vmem:[%s1276_s3 + $0x8] sm:$0xff]  ;;  %v578_v30 = vld [vmem:[%s1276_s3 + $0x18] sm:$0xff]  ;;  %v579_v31 = vld [vmem:[%s1276_s3 + $0x20] sm:$0xff] }
   0xb   :  { %v580_v32 = vld [vmem:[%s1276_s3 + $0x28] sm:$0xff]  ;;  %v581_v33 = vld [vmem:[%s1276_s3 + $0x30] sm:$0xff]  ;;  %v582_v34 = vld [vmem:[%s1276_s3 + $0x38] sm:$0xff] }
   0xc   :  { %295 = vperm.xlu0 %1007, %v237_v12   ;;  %300 = vperm.xlu1 %1008, %v238_v13   ;;  %v583_v35 = vld [vmem:[%s1276_s3 + $0x40] sm:$0xff]  ;;  %v584_v36 = vld [vmem:[%s1276_s3 + $0x48] sm:$0xff]  ;;  %v585_v37 = vld [vmem:[%s1276_s3 + $0x50] sm:$0xff] }
   0xd   :  { %v586_v38 = vld [vmem:[%s1276_s3 + $0x58] sm:$0xff]  ;;  %v587_v39 = vld [vmem:[%s1276_s3 + $0x60] sm:$0xff]  ;;  %v588_v40 = vld [vmem:[%s1276_s3 + $0x68] sm:$0xff] }
   0xe   :  { %946 = vmatmul.mubr.msk.bf16.gmra.mxu0 %vm101_vm1, %v1012_v7  ;;  %v589_v41 = vld [vmem:[%s1276_s3 + $0x70] sm:$0xff]  ;;  %v590_v42 = vld [vmem:[%s1276_s3 + $0x78] sm:$0xff]  ;;  %v1017_v43 = vld [vmem:[%s1277_s0] sm:$0xff]  }
   0xf   :  { %949 = vmatprep.mubr.msk.bf16.mxu0 %vm101_vm1, %v1013_v9  ;;  %v1018_v44 = vld [vmem:[%s1277_s0 + $0x10] sm:$0xff]  }
  0x10   :  { %285 = vperm.xlu0 %1007, %v235_v16   ;;  %290 = vperm.xlu1 %1008, %v236_v17  }
  0x11   :  { %977 = vmatprep.mubr.bf16.mxu1 %v1018_v44 }
  0x14   :  { %275 = vperm.xlu0 %1007, %v233_v18   ;;  %280 = vperm.xlu1 %1008, %v234_v19  }
  0x16   :  { %950 = vmatmul.mubr.msk.bf16.gmra.mxu0 %vm101_vm1, %v1014_v14 }
  0x17   :  { %953 = vmatprep.mubr.msk.bf16.mxu0 %vm101_vm1, %v1015_v15 }
  0x18   :  { %265 = vperm.xlu0 %1007, %v231_v21   ;;  %270 = vperm.xlu1 %1008, %v232_v22  }
  0x1c   :  { %255 = vperm.xlu0 %1007, %v229_v23   ;;  %260 = vperm.xlu1 %1008, %v230_v24  }
  0x1e   :  { %954 = vmatmul.mubr.msk.bf16.gmra.mxu0 %vm101_vm1, %v1016_v20 }
  0x1f   :  { %973 = vmatprep.mubr.bf16.mxu0 %v1017_v43 }
  0x20   :  { %245 = vperm.xlu0 %1007, %v227_v25   ;;  %250 = vperm.xlu1 %1008, %v228_v26  }
  0x24   :  { %593 = vperm.xlu0 %1007, %v575_v27   ;;  %598 = vperm.xlu1 %1008, %v576_v28  }
  0x28   :  { %603 = vperm.xlu0 %1007, %v577_v29   ;;  %608 = vperm.xlu1 %1008, %v578_v30  }
  0x2c   :  { %613 = vperm.xlu0 %1007, %v579_v31   ;;  %618 = vperm.xlu1 %1008, %v580_v32  }
  0x30   :  { %623 = vperm.xlu0 %1007, %v581_v33   ;;  %628 = vperm.xlu1 %1008, %v582_v34  }
  0x34   :  { %633 = vperm.xlu0 %1007, %v583_v35   ;;  %638 = vperm.xlu1 %1008, %v584_v36  }
  0x38   :  { %643 = vperm.xlu0 %1007, %v585_v37   ;;  %648 = vperm.xlu1 %1008, %v586_v38   ;;  %v1019_v37 = vld [vmem:[%s1277_s0 + $0x8] sm:$0xff]   ;;  %v1020_v38 = vld [vmem:[%s1277_s0 + $0x18] sm:$0xff]  }
  0x3c   :  { %653 = vperm.xlu0 %1007, %v587_v39   ;;  %658 = vperm.xlu1 %1008, %v588_v40   ;;  %v1021_v39 = vld [vmem:[%s1277_s0 + $0x20] sm:$0xff]   ;;  %v1022_v40 = vld [vmem:[%s1277_s0 + $0x28] sm:$0xff]  }
  0x40   :  { %663 = vperm.xlu0 %1007, %v589_v41   ;;  %668 = vperm.xlu1 %1008, %v590_v42   ;;  %v1023_v41 = vld [vmem:[%s1277_s0 + $0x30] sm:$0xff]   ;;  %v1024_v42 = vld [vmem:[%s1277_s0 + $0x38] sm:$0xff]  }
  0x7f   :  { %v306_v50 = vpop.permute.xlu1 %305  ;;  %v316_v52 = vpop.permute.xlu0 %315 }
  0x83   :  { %v311_v55 = vpop.permute.xlu1 %310  ;;  %v321_v57 = vpop.permute.xlu0 %320 }
  0x87   :  { %v301_v60 = vpop.permute.xlu1 %300  ;;  %v296_v62 = vpop.permute.xlu0 %295 }
  0x8b   :  { %v291_v1 = vpop.permute.xlu1 %290  ;;  %v286_v5 = vpop.permute.xlu0 %285 }
  0x8f   :  { %v281_v12 = vpop.permute.xlu1 %280  ;;  %v276_v14 = vpop.permute.xlu0 %275 }
  0x93   :  { %v271_v18 = vpop.permute.xlu1 %270  ;;  %v266_v21 = vpop.permute.xlu0 %265 }
  0x97   :  { %v261_v25 = vpop.permute.xlu1 %260  ;;  %v256_v27 = vpop.permute.xlu0 %255 }
  0x9b   :  { %v251_v31 = vpop.permute.xlu1 %250  ;;  %v246_v34 = vpop.permute.xlu0 %245 }
  0x9f   :  { %v594_v43 = vpop.permute.xlu0 %593  ;;  %v599_v44 = vpop.permute.xlu1 %598 }
  0xc6   :  { %v1198_v45 = vpop.f32.mrf.mxu0 }
  0xc7   :  { %v325_v30 = vmul.f32 %v1198_v45, %v256_v27  ;;  %v604_v45 = vpop.permute.xlu0 %603 }
  0xc8   :  { %v1200_v46 = vpop.f32.mrf.mxu0 }
  0xc9   :  { %v323_v35 = vmul.f32 %v246_v34, %v1200_v46  ;;  %v609_v46 = vpop.permute.xlu1 %608 }
  0xca   :  { %v1202_v47 = vpop.f32.mrf.mxu0 }
  0xcb   :  { %v326_v28 = vmul.f32 %v1202_v47, %v261_v25  ;;  %v614_v47 = vpop.permute.xlu0 %613 }
  0xcc   :  { %v1204_v48 = vpop.f32.mrf.mxu0 }
  0xcd   :  { %v372_v32 = vpack.c.bf16 %v326_v28, %v325_v30  ;;  %v324_v33 = vmul.f32 %v251_v31, %v1204_v48  ;;  %v619_v48 = vpop.permute.xlu1 %618 }
  0xce   :  { %v947_v49 = vpop.f32.mrf.mxu0 }
  0xcf   :  { %v329_v22 = vmul.f32 %v947_v49, %v276_v14  ;;  %v371_v36 = vpack.c.bf16 %v324_v33, %v323_v35  ;;  %v624_v49 = vpop.permute.xlu0 %623 }
  0xd0   :  { %v180_v51 = vpop.f32.mrf.mxu0 }
  0xd1   :  { %v327_v26 = vmul.f32 %v266_v21, %v180_v51 }
  0xd2   :  { %v948_v53 = vpop.f32.mrf.mxu0 }
  0xd3   :  { %v330_v19 = vmul.f32 %v948_v53, %v281_v12  ;;  %v634_v51 = vpop.permute.xlu0 %633 }
  0xd4   :  { %v183_v54 = vpop.f32.mrf.mxu0 }
  0xd5   :  { %v374_v23 = vpack.c.bf16 %v330_v19, %v329_v22  ;;  %v328_v24 = vmul.f32 %v271_v18, %v183_v54 }
  0xd6   :  { %v951_v56 = vpop.f32.mrf.mxu0 }
  0xd7   :  { %v333_v13 = vmul.f32 %v951_v56, %v296_v62  ;;  %v373_v29 = vpack.c.bf16 %v328_v24, %v327_v26 }
  0xd8   :  { %v196_v58 = vpop.f32.mrf.mxu0 }
  0xd9   :  { %v331_v17 = vmul.f32 %v286_v5, %v196_v58 }
  0xda   :  { %v952_v59 = vpop.f32.mrf.mxu0 }
  0xdb   :  { %v334_v10 = vmul.f32 %v952_v59, %v301_v60  ;;  %v644_v60 = vpop.permute.xlu0 %643 }
  0xdc   :  { %v199_v61 = vpop.f32.mrf.mxu0 }
  0xdd   :  { %v376_v15 = vpack.c.bf16 %v334_v10, %v333_v13  ;;  %v332_v16 = vmul.f32 %v291_v1, %v199_v61 }
  0xde   :  { %v955_v63 = vpop.f32.mrf.mxu0 }
  0xdf   :  { %v337_v3 = vmul.f32 %v955_v63, %v316_v52  ;;  %v375_v20 = vpack.c.bf16 %v332_v16, %v331_v17  ;;  %v654_v19 = vpop.permute.xlu0 %653 }
  0xe0   :  { %v212_v0 = vpop.f32.mrf.mxu0 }
  0xe1   :  { %v335_v7 = vmul.f32 %v306_v50, %v212_v0  ;;  %v629_v50 = vpop.permute.xlu1 %628 }
  0xe2   :  { %v956_v2 = vpop.f32.mrf.mxu0 }
  0xe3   :  { %v338_v4 = vmul.f32 %v956_v2, %v321_v57  ;;  %v1231_v57 = vld [vmem:[%s1278_s5] ss:$0 sm:$0xff] }
  0xe4   :  { %v215_v6 = vpop.f32.mrf.mxu0 }
  0xe5   :  { %v378_v8 = vpack.c.bf16 %v338_v4, %v337_v3  ;;  %v336_v9 = vmul.f32 %v311_v55, %v215_v6  ;;  %v639_v54 = vpop.permute.xlu1 %638 }
  0xe7   :  { %v377_v11 = vpack.c.bf16 %v336_v9, %v335_v7  ;;  %957 = vmatprep.subr.bf16.mxu0 %v378_v8  ;;  %989 = vmatprep.subr.bf16.mxu1 %v378_v8 }
  0xe8   :  { %958 = vmatpush3.bf16.msra.mxu0 %v378_v8  ;;  %997 = vmatpush3.bf16.msra.mxu1 %v378_v8 }
  0xe9   :  { %959 = vmatprep.subr.bf16.mxu0 %v377_v11  ;;  %990 = vmatprep.subr.bf16.mxu1 %v377_v11 }
  0xec   :  { %960 = vmatpush3.bf16.msra.mxu0 %v377_v11  ;;  %998 = vmatpush3.bf16.msra.mxu1 %v377_v11  ;;  %v649_v11 = vpop.permute.xlu1 %648 }
  0xed   :  { %961 = vmatprep.subr.bf16.mxu0 %v376_v15  ;;  %991 = vmatprep.subr.bf16.mxu1 %v376_v15 }
  0xf0   :  { %962 = vmatpush3.bf16.msra.mxu0 %v376_v15  ;;  %999 = vmatpush3.bf16.msra.mxu1 %v376_v15  ;;  %v659_v34 = vpop.permute.xlu1 %658 }
  0xf1   :  { %963 = vmatprep.subr.bf16.mxu0 %v375_v20  ;;  %992 = vmatprep.subr.bf16.mxu1 %v375_v20 }
  0xf4   :  { %964 = vmatpush3.bf16.msra.mxu0 %v375_v20  ;;  %1000 = vmatpush3.bf16.msra.mxu1 %v375_v20 }
  0xf5   :  { %965 = vmatprep.subr.bf16.mxu0 %v374_v23  ;;  %993 = vmatprep.subr.bf16.mxu1 %v374_v23 }
  0xf8   :  { %966 = vmatpush3.bf16.msra.mxu0 %v374_v23  ;;  %1001 = vmatpush3.bf16.msra.mxu1 %v374_v23 }
  0xf9   :  { %967 = vmatprep.subr.bf16.mxu0 %v373_v29  ;;  %994 = vmatprep.subr.bf16.mxu1 %v373_v29 }
  0xfc   :  { %968 = vmatpush3.bf16.msra.mxu0 %v373_v29  ;;  %1002 = vmatpush3.bf16.msra.mxu1 %v373_v29 }
  0xfd   :  { %969 = vmatprep.subr.bf16.mxu0 %v372_v32  ;;  %995 = vmatprep.subr.bf16.mxu1 %v372_v32 }
 0x100   :  { %970 = vmatpush3.bf16.msra.mxu0 %v372_v32  ;;  %1003 = vmatpush3.bf16.msra.mxu1 %v372_v32 }
 0x101   :  { %971 = vmatprep.subr.bf16.mxu0 %v371_v36  ;;  %996 = vmatprep.subr.bf16.mxu1 %v371_v36 }
 0x104   :  { %972 = vmatpush3.bf16.msra.mxu0 %v371_v36  ;;  %1004 = vmatpush3.bf16.msra.mxu1 %v371_v36 }
 0x107   :  { %974 = vmatmul.mubr.bf16.vlgmr.msra.gmra.mxu0 %v1019_v37  ;;  %978 = vmatmul.mubr.bf16.vlgmr.msra.gmra.mxu1 %v1020_v38 }
 0x108   :  { %981 = vmatprep.mubr.bf16.mxu1 %v1021_v39 }
 0x10f   :  { %982 = vmatmul.mubr.bf16.gmra.mxu1 %v1022_v40  ;;  %v664_v40 = vpop.permute.xlu0 %663 }
 0x110   :  { %985 = vmatprep.mubr.bf16.mxu1 %v1023_v41 }
 0x117   :  { %986 = vmatmul.mubr.bf16.gmra.mxu1 %v1024_v42 }
 0x1c7   :  { %v975_v52 = vpop.f32.mrf.mxu0  ;;  %v979_v53 = vpop.f32.mrf.mxu1 }
 0x1c8   :  { %v673_v55 = vmul.f32 %v975_v52, %v604_v45  ;;  %v677_v56 = vmul.f32 %v979_v53, %v624_v49 }
 0x1c9   :  { %v461_v58 = vpop.f32.mrf.mxu0  ;;  %v477_v59 = vpop.f32.mrf.mxu1 }
 0x1ca   :  { %v671_v61 = vmul.f32 %v594_v43, %v461_v58  ;;  %v675_v62 = vmul.f32 %v614_v47, %v477_v59  ;;  %v696_v1 = vadd.f32 %v1231_v57, %v673_v55  ;;  %v700_v2 = vadd.f32 %v1231_v57, %v677_v56 }
 0x1cb   :  { %v976_v63 = vpop.f32.mrf.mxu0  ;;  %v980_v0 = vpop.f32.mrf.mxu1 }
 0x1cc   :  { %v694_v3 = vadd.f32 %v1231_v57, %v671_v61  ;;  %v674_v4 = vmul.f32 %v976_v63, %v609_v46  ;;  %v678_v5 = vmul.f32 %v980_v0, %v629_v50  ;;  %v698_v8 = vadd.f32 %v1231_v57, %v675_v62 }
 0x1cd   :  { %v464_v6 = vpop.f32.mrf.mxu0  ;;  %v480_v7 = vpop.f32.mrf.mxu1  ;;  %v712_v15 = vmax.f32 %v696_v1, 0.0  ;;  %v716_v16 = vmax.f32 %v700_v2, 0.0 }
 0x1ce   :  { %v672_v9 = vmul.f32 %v599_v44, %v464_v6  ;;  %v676_v10 = vmul.f32 %v619_v48, %v480_v7  ;;  %v697_v12 = vadd.f32 %v1231_v57, %v674_v4  ;;  %v701_v13 = vadd.f32 %v1231_v57, %v678_v5 }
 0x1cf   :  { %v983_v14 = vpop.f32.mrf.mxu1  ;;  %v710_v20 = vmax.f32 %v694_v3, 0.0  ;;  %v714_v25 = vmax.f32 %v698_v8, 0.0 }
 0x1d0   :  { %v695_v17 = vadd.f32 %v1231_v57, %v672_v9  ;;  %v699_v18 = vadd.f32 %v1231_v57, %v676_v10  ;;  %v713_v21 = vmax.f32 %v697_v12, 0.0  ;;  %v717_v22 = vmax.f32 %v701_v13, 0.0 }
 0x1d1   :  { %v681_v23 = vmul.f32 %v983_v14, %v644_v60  ;;  %v493_v24 = vpop.f32.mrf.mxu1 }
 0x1d2   :  { %v711_v26 = vmax.f32 %v695_v17, 0.0  ;;  %v715_v27 = vmax.f32 %v699_v18, 0.0  ;;  %v679_v28 = vmul.f32 %v634_v51, %v493_v24  ;;  %v875_v29 = vpack.c.bf16 %v713_v21, %v712_v15  ;;  %v669_v51 = vpop.permute.xlu1 %668 }
 0x1d3   :  { %v885_v30 = vpack.c.bf16 %v717_v22, %v716_v16  ;;  %v984_v31 = vpop.f32.mrf.mxu1  ;;  %v704_v35 = vadd.f32 %v1231_v57, %v681_v23 }
 0x1d4   :  { %v870_v32 = vpack.c.bf16 %v711_v26, %v710_v20  ;;  %v880_v33 = vpack.c.bf16 %v715_v27, %v714_v25  ;;  %907 = vst [vmem:[%s1279_s6 + $0x8] sm:$0xff] %v875_v29   ;;  %v682_v36 = vmul.f32 %v984_v31, %v649_v11  ;;  %v702_v38 = vadd.f32 %v1231_v57, %v679_v28 }
 0x1d5   :  { %909 = vst [vmem:[%s1279_s6 + $0x18] sm:$0xff] %v885_v30   ;;  %v496_v37 = vpop.f32.mrf.mxu1  ;;  %v720_v45 = vmax.f32 %v704_v35, 0.0 }
 0x1d6   :  { %871 = vst [vmem:[%s1279_s6] sm:$0xff] %v870_v32   ;;  %908 = vst [vmem:[%s1279_s6 + $0x10] sm:$0xff] %v880_v33   ;;  %v680_v39 = vmul.f32 %v639_v54, %v496_v37  ;;  %v705_v41 = vadd.f32 %v1231_v57, %v682_v36  ;;  %v718_v48 = vmax.f32 %v702_v38, 0.0 }
 0x1d7   :  { %v987_v42 = vpop.f32.mrf.mxu1 }
 0x1d8   :  { %v703_v43 = vadd.f32 %v1231_v57, %v680_v39  ;;  %v685_v44 = vmul.f32 %v987_v42, %v664_v40  ;;  %v721_v46 = vmax.f32 %v705_v41, 0.0 }
 0x1d9   :  { %v509_v47 = vpop.f32.mrf.mxu1 }
 0x1da   :  { %v719_v49 = vmax.f32 %v703_v43, 0.0  ;;  %v683_v50 = vmul.f32 %v654_v19, %v509_v47  ;;  %v895_v52 = vpack.c.bf16 %v721_v46, %v720_v45  ;;  %v708_v56 = vadd.f32 %v1231_v57, %v685_v44 }
 0x1db   :  { %v988_v53 = vpop.f32.mrf.mxu1 }
 0x1dc   :  { %v890_v55 = vpack.c.bf16 %v719_v49, %v718_v48  ;;  %v686_v54 = vmul.f32 %v988_v53, %v669_v51  ;;  %911 = vst [vmem:[%s1279_s6 + $0x28] sm:$0xff] %v895_v52   ;;  %v706_v59 = vadd.f32 %v1231_v57, %v683_v50  ;;  %v724_v62 = vmax.f32 %v708_v56, 0.0 }
 0x1dd   :  { %v512_v58 = vpop.f32.mrf.mxu1 }
 0x1de   :  { %910 = vst [vmem:[%s1279_s6 + $0x20] sm:$0xff] %v890_v55   ;;  %v709_v60 = vadd.f32 %v1231_v57, %v686_v54  ;;  %v684_v61 = vmul.f32 %v659_v34, %v512_v58  ;;  %v722_v1 = vmax.f32 %v706_v59, 0.0 }
 0x1e0   :  { %v725_v63 = vmax.f32 %v709_v60, 0.0  ;;  %v707_v0 = vadd.f32 %v1231_v57, %v684_v61 }
 0x1e2   :  { %v905_v2 = vpack.c.bf16 %v725_v63, %v724_v62  ;;  %v723_v3 = vmax.f32 %v707_v0, 0.0 }
 0x1e4   :  { %913 = vst [vmem:[%s1279_s6 + $0x38] sm:$0xff] %v905_v2   ;;  %v900_v4 = vpack.c.bf16 %v723_v3, %v722_v1 }
 0x1e6   :  { %912 = vst [vmem:[%s1279_s6 + $0x30] sm:$0xff] %v900_v4  }

// kernel: gnn_forward.3
= control target key start
LH: loop header
LB: loop body
LE: loop exit
PB: predicated region body
PF: predicated region fallthrough
CT: control target
= control target key end

     0   :  { %v1160_v1 = vmov 0   ;;  %s1580_s4 = inlined_call_operand.vmem [shape: bf16[128,128], index: 4, kind: input, shape index: {}]   ;;  %s1581_s1 = inlined_call_operand.vmem [shape: bf16[128,128], index: 1, kind: input, shape index: {}]   ;;  %s1582_s2 = inlined_call_operand.vmem [shape: f32[128,1], index: 2, kind: input, shape index: {}, may-alias: {2,3}]   ;;  %s1583_s3 = inlined_call_operand.vmem [shape: f32[128,1], index: 3, kind: input, shape index: {}, may-alias: {2,3}]   ;;  %s1584_s0 = inlined_call_operand.vmem [shape: bf16[128,128], index: 0, kind: input, shape index: {}]   ;;  %s1585_s5 = inlined_call_operand.vmem [shape: f32[1,128], index: 5, kind: input, shape index: {}]   ;;  %s1586_s6 = inlined_call_operand.vmem [shape: f32[128,128], index: 6, kind: output, shape index: {}]  }
   0x1   :  { %v1072_v0 = vld [vmem:[%s1580_s4 + $0x38] sm:$0xff]   ;;  %1070 = vset.pattern.permute.xlu0 %v1160_v1  ;;  %1071 = vset.pattern.permute.xlu1 %v1160_v1  ;;  %v1073_v2 = vld [vmem:[%s1580_s4 + $0x30] sm:$0xff]   ;;  %v1074_v3 = vld [vmem:[%s1580_s4 + $0x28] sm:$0xff]  }
   0x2   :  { %1005 = vmatprep.subr.bf16.mxu0 %v1072_v0  ;;  %v1075_v4 = vld [vmem:[%s1580_s4 + $0x20] sm:$0xff]   ;;  %v1076_v6 = vld [vmem:[%s1580_s4 + $0x18] sm:$0xff]   ;;  %v1077_v7 = vld [vmem:[%s1580_s4 + $0x10] sm:$0xff]  }
   0x3   :  { %1006 = vmatpush3.bf16.msra.mxu0 %v1072_v0  ;;  %v1080_v5 = vld [vmem:[%s1581_s1] sm:$0xff]   ;;  %v283_v8 = vld [vmem:[%s1582_s2 + $0x70] sm:$0xff]  ;;  %v284_v10 = vld [vmem:[%s1582_s2 + $0x78] sm:$0xff] }
   0x4   :  { %1007 = vmatprep.subr.bf16.mxu0 %v1073_v2  ;;  %1021 = vmatprep.mubr.bf16.mxu0 %v1080_v5  ;;  %v281_v9 = vld [vmem:[%s1582_s2 + $0x60] sm:$0xff]  ;;  %v282_v11 = vld [vmem:[%s1582_s2 + $0x68] sm:$0xff]  ;;  %v279_v13 = vld [vmem:[%s1582_s2 + $0x50] sm:$0xff] }
   0x5   :  { %357 = vperm.xlu0 %1070, %v283_v8   ;;  %347 = vperm.xlu1 %1071, %v281_v9   ;;  %v1078_v12 = vld [vmem:[%s1580_s4 + $0x8] sm:$0xff]   ;;  %v280_v14 = vld [vmem:[%s1582_s2 + $0x58] sm:$0xff]  ;;  %v1079_v15 = vld [vmem:[%s1580_s4] sm:$0xff]  }
   0x6   :  { %v277_v16 = vld [vmem:[%s1582_s2 + $0x40] sm:$0xff]  ;;  %v278_v17 = vld [vmem:[%s1582_s2 + $0x48] sm:$0xff]  ;;  %v275_v19 = vld [vmem:[%s1582_s2 + $0x30] sm:$0xff] }
   0x7   :  { %1008 = vmatpush3.bf16.msra.mxu0 %v1073_v2  ;;  %v1081_v18 = vld [vmem:[%s1581_s1 + $0x8] sm:$0xff]   ;;  %v276_v20 = vld [vmem:[%s1582_s2 + $0x38] sm:$0xff]  ;;  %v1082_v21 = vld [vmem:[%s1581_s1 + $0x10] sm:$0xff]  }
   0x8   :  { %1009 = vmatprep.subr.bf16.mxu0 %v1074_v3  ;;  %v273_v22 = vld [vmem:[%s1582_s2 + $0x20] sm:$0xff]  ;;  %v274_v23 = vld [vmem:[%s1582_s2 + $0x28] sm:$0xff]  ;;  %v1083_v24 = vld [vmem:[%s1581_s1 + $0x18] sm:$0xff]  }
   0x9   :  { %362 = vperm.xlu0 %1070, %v284_v10   ;;  %352 = vperm.xlu1 %1071, %v282_v11   ;;  %v271_v25 = vld [vmem:[%s1582_s2 + $0x10] sm:$0xff]  ;;  %v272_v26 = vld [vmem:[%s1582_s2 + $0x18] sm:$0xff]  ;;  %v1084_v27 = vld [vmem:[%s1581_s1 + $0x20] sm:$0xff]  }
   0xa   :  { %v269_v28 = vld [vmem:[%s1582_s2] sm:$0xff]  ;;  %v270_v29 = vld [vmem:[%s1582_s2 + $0x8] sm:$0xff]  ;;  %v1086_v33 = vld [vmem:[%s1581_s1 + $0x30] sm:$0xff]  }
   0xb   :  { %1010 = vmatpush3.bf16.msra.mxu0 %v1074_v3  ;;  %v1085_v30 = vld [vmem:[%s1581_s1 + $0x28] sm:$0xff]   ;;  %v617_v31 = vld [vmem:[%s1583_s3] sm:$0xff]  ;;  %v619_v34 = vld [vmem:[%s1583_s3 + $0x10] sm:$0xff] }
   0xc   :  { %1011 = vmatprep.subr.bf16.mxu0 %v1075_v4  ;;  %v618_v32 = vld [vmem:[%s1583_s3 + $0x8] sm:$0xff]  ;;  %v620_v35 = vld [vmem:[%s1583_s3 + $0x18] sm:$0xff]  ;;  %v621_v37 = vld [vmem:[%s1583_s3 + $0x20] sm:$0xff] }
   0xd   :  { %337 = vperm.xlu0 %1070, %v279_v13   ;;  %342 = vperm.xlu1 %1071, %v280_v14   ;;  %v1087_v36 = vld [vmem:[%s1581_s1 + $0x38] sm:$0xff]   ;;  %v622_v38 = vld [vmem:[%s1583_s3 + $0x28] sm:$0xff]  ;;  %v623_v39 = vld [vmem:[%s1583_s3 + $0x30] sm:$0xff] }
   0xe   :  { %v624_v40 = vld [vmem:[%s1583_s3 + $0x38] sm:$0xff]  ;;  %v625_v41 = vld [vmem:[%s1583_s3 + $0x40] sm:$0xff]  ;;  %v626_v42 = vld [vmem:[%s1583_s3 + $0x48] sm:$0xff] }
   0xf   :  { %1012 = vmatpush3.bf16.msra.mxu0 %v1075_v4  ;;  %v627_v43 = vld [vmem:[%s1583_s3 + $0x50] sm:$0xff]  ;;  %v628_v44 = vld [vmem:[%s1583_s3 + $0x58] sm:$0xff]  ;;  %v629_v45 = vld [vmem:[%s1583_s3 + $0x60] sm:$0xff] }
  0x10   :  { %1013 = vmatprep.subr.bf16.mxu0 %v1076_v6  ;;  %v630_v46 = vld [vmem:[%s1583_s3 + $0x68] sm:$0xff]  ;;  %v631_v47 = vld [vmem:[%s1583_s3 + $0x70] sm:$0xff]  ;;  %v632_v48 = vld [vmem:[%s1583_s3 + $0x78] sm:$0xff] }
  0x11   :  { %327 = vperm.xlu0 %1070, %v277_v16   ;;  %332 = vperm.xlu1 %1071, %v278_v17   ;;  %v1088_v49 = vld [vmem:[%s1584_s0] sm:$0xff]  }
  0x12   :  { %1053 = vmatprep.mubr.bf16.mxu1 %v1088_v49 }
  0x13   :  { %1014 = vmatpush3.bf16.msra.mxu0 %v1076_v6 }
  0x14   :  { %1015 = vmatprep.subr.bf16.mxu0 %v1077_v7 }
  0x15   :  { %317 = vperm.xlu0 %1070, %v275_v19   ;;  %322 = vperm.xlu1 %1071, %v276_v20  }
  0x17   :  { %1016 = vmatpush3.bf16.msra.mxu0 %v1077_v7 }
  0x18   :  { %1017 = vmatprep.subr.bf16.mxu0 %v1078_v12 }
  0x19   :  { %307 = vperm.xlu0 %1070, %v273_v22   ;;  %312 = vperm.xlu1 %1071, %v274_v23  }
  0x1b   :  { %1018 = vmatpush3.bf16.msra.mxu0 %v1078_v12 }
  0x1c   :  { %1019 = vmatprep.subr.bf16.mxu0 %v1079_v15 }
  0x1d   :  { %297 = vperm.xlu0 %1070, %v271_v25   ;;  %302 = vperm.xlu1 %1071, %v272_v26  }
  0x1f   :  { %1020 = vmatpush3.bf16.msra.mxu0 %v1079_v15 }
  0x21   :  { %287 = vperm.xlu0 %1070, %v269_v28   ;;  %292 = vperm.xlu1 %1071, %v270_v29  }
  0x22   :  { %1022 = vmatmul.mubr.bf16.vlgmr.msra.gmra.mxu0 %v1081_v18 }
  0x23   :  { %1025 = vmatprep.mubr.bf16.mxu0 %v1082_v21 }
  0x25   :  { %635 = vperm.xlu0 %1070, %v617_v31   ;;  %640 = vperm.xlu1 %1071, %v618_v32  }
  0x29   :  { %645 = vperm.xlu0 %1070, %v619_v34   ;;  %650 = vperm.xlu1 %1071, %v620_v35  }
  0x2a   :  { %1026 = vmatmul.mubr.bf16.gmra.mxu0 %v1083_v24 }
  0x2b   :  { %1029 = vmatprep.mubr.bf16.mxu0 %v1084_v27 }
  0x2d   :  { %655 = vperm.xlu0 %1070, %v621_v37   ;;  %660 = vperm.xlu1 %1071, %v622_v38  }
  0x31   :  { %665 = vperm.xlu0 %1070, %v623_v39   ;;  %670 = vperm.xlu1 %1071, %v624_v40  }
  0x32   :  { %1030 = vmatmul.mubr.bf16.gmra.mxu0 %v1085_v30 }
  0x33   :  { %1033 = vmatprep.mubr.bf16.mxu0 %v1086_v33 }
  0x35   :  { %675 = vperm.xlu0 %1070, %v625_v41   ;;  %680 = vperm.xlu1 %1071, %v626_v42   ;;  %v1089_v42 = vld [vmem:[%s1584_s0 + $0x8] sm:$0xff]  }
  0x39   :  { %685 = vperm.xlu0 %1070, %v627_v43   ;;  %690 = vperm.xlu1 %1071, %v628_v44   ;;  %v1090_v43 = vld [vmem:[%s1584_s0 + $0x10] sm:$0xff]   ;;  %v1091_v44 = vld [vmem:[%s1584_s0 + $0x18] sm:$0xff]  }
  0x3a   :  { %1034 = vmatmul.mubr.bf16.gmra.mxu0 %v1087_v36 }
  0x3d   :  { %695 = vperm.xlu0 %1070, %v629_v45   ;;  %700 = vperm.xlu1 %1071, %v630_v46   ;;  %v1092_v45 = vld [vmem:[%s1584_s0 + $0x20] sm:$0xff]   ;;  %v1093_v46 = vld [vmem:[%s1584_s0 + $0x28] sm:$0xff]  }
  0x41   :  { %705 = vperm.xlu0 %1070, %v631_v47   ;;  %710 = vperm.xlu1 %1071, %v632_v48   ;;  %v1094_v47 = vld [vmem:[%s1584_s0 + $0x30] sm:$0xff]   ;;  %v1095_v48 = vld [vmem:[%s1584_s0 + $0x38] sm:$0xff]  }
  0x80   :  { %v348_v55 = vpop.permute.xlu1 %347  ;;  %v358_v57 = vpop.permute.xlu0 %357 }
  0x84   :  { %v353_v60 = vpop.permute.xlu1 %352  ;;  %v363_v62 = vpop.permute.xlu0 %362 }
  0x88   :  { %v343_v1 = vpop.permute.xlu1 %342  ;;  %v338_v3 = vpop.permute.xlu0 %337 }
  0x8c   :  { %v333_v6 = vpop.permute.xlu1 %332  ;;  %v328_v10 = vpop.permute.xlu0 %327 }
  0x90   :  { %v323_v17 = vpop.permute.xlu1 %322  ;;  %v318_v19 = vpop.permute.xlu0 %317 }
  0x94   :  { %v313_v23 = vpop.permute.xlu1 %312  ;;  %v308_v26 = vpop.permute.xlu0 %307 }
  0x98   :  { %v303_v30 = vpop.permute.xlu1 %302  ;;  %v298_v32 = vpop.permute.xlu0 %297 }
  0x9c   :  { %v293_v36 = vpop.permute.xlu1 %292  ;;  %v288_v39 = vpop.permute.xlu0 %287 }
  0xa0   :  { %v636_v49 = vpop.permute.xlu0 %635 }
  0xe2   :  { %v1023_v50 = vpop.f32.mrf.mxu0 }
  0xe3   :  { %v367_v35 = vmul.f32 %v1023_v50, %v298_v32  ;;  %v641_v50 = vpop.permute.xlu1 %640 }
  0xe4   :  { %v1343_v51 = vpop.f32.mrf.mxu0 }
  0xe5   :  { %v365_v40 = vmul.f32 %v288_v39, %v1343_v51  ;;  %v646_v51 = vpop.permute.xlu0 %645 }
  0xe6   :  { %v1024_v52 = vpop.f32.mrf.mxu0 }
  0xe7   :  { %v368_v33 = vmul.f32 %v1024_v52, %v303_v30  ;;  %v651_v52 = vpop.permute.xlu1 %650 }
  0xe8   :  { %v209_v53 = vpop.f32.mrf.mxu0 }
  0xe9   :  { %v414_v37 = vpack.c.bf16 %v368_v33, %v367_v35  ;;  %v366_v38 = vmul.f32 %v293_v36, %v209_v53  ;;  %v656_v53 = vpop.permute.xlu0 %655 }
  0xea   :  { %v1027_v54 = vpop.f32.mrf.mxu0 }
  0xeb   :  { %v371_v27 = vmul.f32 %v1027_v54, %v318_v19  ;;  %v413_v41 = vpack.c.bf16 %v366_v38, %v365_v40 }
  0xec   :  { %v222_v56 = vpop.f32.mrf.mxu0 }
  0xed   :  { %v369_v31 = vmul.f32 %v308_v26, %v222_v56 }
  0xee   :  { %v1028_v58 = vpop.f32.mrf.mxu0 }
  0xef   :  { %v372_v24 = vmul.f32 %v1028_v58, %v323_v17 }
  0xf0   :  { %v225_v59 = vpop.f32.mrf.mxu0 }
  0xf1   :  { %v416_v28 = vpack.c.bf16 %v372_v24, %v371_v27  ;;  %v370_v29 = vmul.f32 %v313_v23, %v225_v59 }
  0xf2   :  { %v1031_v61 = vpop.f32.mrf.mxu0 }
  0xf3   :  { %v375_v18 = vmul.f32 %v1031_v61, %v338_v3  ;;  %v415_v34 = vpack.c.bf16 %v370_v29, %v369_v31  ;;  %v666_v61 = vpop.permute.xlu0 %665 }
  0xf4   :  { %v238_v63 = vpop.f32.mrf.mxu0 }
  0xf5   :  { %v373_v22 = vmul.f32 %v328_v10, %v238_v63 }
  0xf6   :  { %v1032_v0 = vpop.f32.mrf.mxu0 }
  0xf7   :  { %v376_v15 = vmul.f32 %v1032_v0, %v343_v1 }
  0xf8   :  { %v241_v2 = vpop.f32.mrf.mxu0 }
  0xf9   :  { %v418_v20 = vpack.c.bf16 %v376_v15, %v375_v18  ;;  %v374_v21 = vmul.f32 %v333_v6, %v241_v2 }
  0xfa   :  { %v1035_v4 = vpop.f32.mrf.mxu0 }
  0xfb   :  { %v379_v8 = vmul.f32 %v1035_v4, %v358_v57  ;;  %v417_v25 = vpack.c.bf16 %v374_v21, %v373_v22  ;;  %v661_v57 = vpop.permute.xlu1 %660 }
  0xfc   :  { %v254_v5 = vpop.f32.mrf.mxu0 }
  0xfd   :  { %v377_v12 = vmul.f32 %v348_v55, %v254_v5  ;;  %v1370_v55 = vld [vmem:[%s1585_s5] ss:$0 sm:$0xff] }
  0xfe   :  { %v1036_v7 = vpop.f32.mrf.mxu0 }
  0xff   :  { %v380_v9 = vmul.f32 %v1036_v7, %v363_v62  ;;  %v671_v3 = vpop.permute.xlu1 %670  ;;  %v676_v7 = vpop.permute.xlu0 %675 }
 0x100   :  { %v257_v11 = vpop.f32.mrf.mxu0 }
 0x101   :  { %v378_v13 = vmul.f32 %v353_v60, %v257_v11  ;;  %v420_v14 = vpack.c.bf16 %v380_v9, %v379_v8 }
 0x103   :  { %v419_v16 = vpack.c.bf16 %v378_v13, %v377_v12  ;;  %1037 = vmatprep.subr.bf16.mxu1 %v420_v14  ;;  %v686_v18 = vpop.permute.xlu0 %685 }
 0x104   :  { %1038 = vmatpush3.bf16.msra.mxu1 %v420_v14  ;;  %v681_v14 = vpop.permute.xlu1 %680 }
 0x105   :  { %1039 = vmatprep.subr.bf16.mxu1 %v419_v16 }
 0x107   :  { %v696_v29 = vpop.permute.xlu0 %695 }
 0x108   :  { %1040 = vmatpush3.bf16.msra.mxu1 %v419_v16  ;;  %v691_v24 = vpop.permute.xlu1 %690 }
 0x109   :  { %1041 = vmatprep.subr.bf16.mxu1 %v418_v20 }
 0x10b   :  { %v706_v39 = vpop.permute.xlu0 %705 }
 0x10c   :  { %1042 = vmatpush3.bf16.msra.mxu1 %v418_v20  ;;  %v701_v35 = vpop.permute.xlu1 %700 }
 0x10d   :  { %1043 = vmatprep.subr.bf16.mxu1 %v417_v25 }
 0x110   :  { %1044 = vmatpush3.bf16.msra.mxu1 %v417_v25 }
 0x111   :  { %1045 = vmatprep.subr.bf16.mxu1 %v416_v28 }
 0x114   :  { %1046 = vmatpush3.bf16.msra.mxu1 %v416_v28 }
 0x115   :  { %1047 = vmatprep.subr.bf16.mxu1 %v415_v34 }
 0x118   :  { %1048 = vmatpush3.bf16.msra.mxu1 %v415_v34 }
 0x119   :  { %1049 = vmatprep.subr.bf16.mxu1 %v414_v37 }
 0x11c   :  { %1050 = vmatpush3.bf16.msra.mxu1 %v414_v37 }
 0x11d   :  { %1051 = vmatprep.subr.bf16.mxu1 %v413_v41 }
 0x120   :  { %1052 = vmatpush3.bf16.msra.mxu1 %v413_v41 }
 0x123   :  { %1054 = vmatmul.mubr.bf16.vlgmr.msra.gmra.mxu1 %v1089_v42 }
 0x124   :  { %1057 = vmatprep.mubr.bf16.mxu1 %v1090_v43 }
 0x12b   :  { %1058 = vmatmul.mubr.bf16.gmra.mxu1 %v1091_v44 }
 0x12c   :  { %1061 = vmatprep.mubr.bf16.mxu1 %v1092_v45  ;;  %v711_v45 = vpop.permute.xlu1 %710 }
 0x133   :  { %1062 = vmatmul.mubr.bf16.gmra.mxu1 %v1093_v46 }
 0x134   :  { %1065 = vmatprep.mubr.bf16.mxu1 %v1094_v47 }
 0x13b   :  { %1066 = vmatmul.mubr.bf16.gmra.mxu1 %v1095_v48 }
 0x1e3   :  { %v1055_v54 = vpop.f32.mrf.mxu1 }
 0x1e4   :  { %v715_v56 = vmul.f32 %v1055_v54, %v646_v51 }
 0x1e5   :  { %v503_v58 = vpop.f32.mrf.mxu1 }
 0x1e6   :  { %v1373_v59 = vadd.f32 %v1370_v55, %v715_v56  ;;  %v713_v60 = vmul.f32 %v636_v49, %v503_v58 }
 0x1e7   :  { %v1056_v62 = vpop.f32.mrf.mxu1 }
 0x1e8   :  { %756 = vmax.xlane.f32.xlu0 %v1373_v59  ;;  %v1377_v0 = vadd.f32 %v1370_v55, %v713_v60  ;;  %v716_v1 = vmul.f32 %v1056_v62, %v651_v52 }
 0x1e9   :  { %v506_v63 = vpop.f32.mrf.mxu1 }
 0x1ea   :  { %v714_v2 = vmul.f32 %v641_v50, %v506_v63  ;;  %v1384_v9 = vadd.f32 %v1370_v55, %v716_v1 }
 0x1eb   :  { %v1059_v4 = vpop.f32.mrf.mxu1 }
 0x1ec   :  { %v1380_v5 = vadd.f32 %v1370_v55, %v714_v2  ;;  %v719_v6 = vmul.f32 %v1059_v4, %v666_v61  ;;  %752 = vmax.xlane.f32.xlu0 %v1377_v0 }
 0x1ed   :  { %v519_v8 = vpop.f32.mrf.mxu1 }
 0x1ee   :  { %754 = vmax.xlane.f32.xlu1 %v1380_v5  ;;  %v1388_v11 = vadd.f32 %v1370_v55, %v719_v6  ;;  %v717_v12 = vmul.f32 %v656_v53, %v519_v8 }
 0x1ef   :  { %v1060_v10 = vpop.f32.mrf.mxu1 }
 0x1f0   :  { %v720_v13 = vmul.f32 %v1060_v10, %v671_v3  ;;  %758 = vmax.xlane.f32.xlu0 %v1384_v9  ;;  %v1396_v20 = vadd.f32 %v1370_v55, %v717_v12 }
 0x1f1   :  { %v522_v15 = vpop.f32.mrf.mxu1 }
 0x1f2   :  { %v1392_v16 = vadd.f32 %v1370_v55, %v720_v13  ;;  %v718_v17 = vmul.f32 %v661_v57, %v522_v15  ;;  %764 = vmax.xlane.f32.xlu1 %v1388_v11 }
 0x1f3   :  { %v1063_v19 = vpop.f32.mrf.mxu1 }
 0x1f4   :  { %v723_v21 = vmul.f32 %v1063_v19, %v686_v18  ;;  %766 = vmax.xlane.f32.xlu0 %v1392_v16  ;;  %v1400_v23 = vadd.f32 %v1370_v55, %v718_v17 }
 0x1f5   :  { %v535_v22 = vpop.f32.mrf.mxu1 }
 0x1f6   :  { %760 = vmax.xlane.f32.xlu1 %v1396_v20  ;;  %v1404_v26 = vadd.f32 %v1370_v55, %v723_v21  ;;  %v721_v27 = vmul.f32 %v676_v7, %v535_v22 }
 0x1f7   :  { %v1064_v25 = vpop.f32.mrf.mxu1 }
 0x1f8   :  { %v724_v28 = vmul.f32 %v1064_v25, %v691_v24  ;;  %762 = vmax.xlane.f32.xlu0 %v1400_v23  ;;  %v1412_v34 = vadd.f32 %v1370_v55, %v721_v27 }
 0x1f9   :  { %v538_v30 = vpop.f32.mrf.mxu1 }
 0x1fa   :  { %v1408_v31 = vadd.f32 %v1370_v55, %v724_v28  ;;  %v722_v32 = vmul.f32 %v681_v14, %v538_v30  ;;  %772 = vmax.xlane.f32.xlu1 %v1404_v26 }
 0x1fb   :  { %v1067_v33 = vpop.f32.mrf.mxu1 }
 0x1fc   :  { %774 = vmax.xlane.f32.xlu0 %v1408_v31  ;;  %v1416_v37 = vadd.f32 %v1370_v55, %v722_v32  ;;  %v727_v41 = vmul.f32 %v1067_v33, %v706_v39 }
 0x1fd   :  { %v551_v36 = vpop.f32.mrf.mxu1 }
 0x1fe   :  { %v725_v38 = vmul.f32 %v696_v29, %v551_v36  ;;  %768 = vmax.xlane.f32.xlu1 %v1412_v34  ;;  %v1425_v46 = vadd.f32 %v1370_v55, %v727_v41 }
 0x1ff   :  { %v1068_v40 = vpop.f32.mrf.mxu1 }
 0x200   :  { %v1420_v42 = vadd.f32 %v1370_v55, %v725_v38  ;;  %770 = vmax.xlane.f32.xlu0 %v1416_v37  ;;  %v728_v47 = vmul.f32 %v1068_v40, %v711_v45 }
 0x201   :  { %v554_v43 = vpop.f32.mrf.mxu1 }
 0x202   :  { %v726_v44 = vmul.f32 %v701_v35, %v554_v43  ;;  %776 = vmax.xlane.f32.xlu1 %v1420_v42  ;;  %v1433_v49 = vadd.f32 %v1370_v55, %v728_v47 }
 0x204   :  { %v1428_v48 = vadd.f32 %v1370_v55, %v726_v44 }
 0x206   :  { %780 = vmax.xlane.f32.xlu1 %v1425_v46  ;;  %778 = vmax.xlane.f32.xlu0 %v1428_v48 }
 0x20a   :  { %782 = vmax.xlane.f32.xlu0 %v1433_v49 }
 0x271   :  { %v1436_v50 = vpop.xlane.xlu0 %756 }
 0x272   :  { %v786_v51 = vsub.f32 %v1373_v59, %v1436_v50 }
 0x274   :  { %v804_v52 = vmul.f32 1.442695, %v786_v51 }
 0x275   :  { %v1440_v53 = vpop.xlane.xlu0 %752 }
 0x276   :  { %1096 = vpow2.f32 %v804_v52  ;;  %v784_v54 = vsub.f32 %v1377_v0, %v1440_v53 }
 0x277   :  { %v1444_v56 = vpop.xlane.xlu1 %754 }
 0x278   :  { %v800_v57 = vmul.f32 1.442695, %v784_v54  ;;  %v785_v55 = vsub.f32 %v1380_v5, %v1444_v56 }
 0x279   :  { %v1446_v58 = vpop.xlane.xlu0 %758 }
 0x27a   :  { %1098 = vpow2.f32 %v800_v57  ;;  %v787_v60 = vsub.f32 %v1384_v9, %v1446_v58  ;;  %v802_v2 = vmul.f32 1.442695, %v785_v55 }
 0x27b   :  { %v1452_v61 = vpop.xlane.xlu1 %764 }
 0x27c   :  { %v806_v62 = vmul.f32 1.442695, %v787_v60  ;;  %v790_v63 = vsub.f32 %v1388_v11, %v1452_v61 }
 0x27d   :  { %v1456_v1 = vpop.xlane.xlu0 %766 }
 0x27e   :  { %1100 = vpow2.f32 %v806_v62  ;;  %v812_v3 = vmul.f32 1.442695, %v790_v63  ;;  %v791_v4 = vsub.f32 %v1392_v16, %v1456_v1 }
 0x27f   :  { %v1460_v6 = vpop.xlane.xlu1 %760 }
 0x280   :  { %1102 = vpow2.f32 %v812_v3  ;;  %v788_v7 = vsub.f32 %v1396_v20, %v1460_v6  ;;  %v814_v10 = vmul.f32 1.442695, %v791_v4 }
 0x281   :  { %v1464_v8 = vpop.xlane.xlu0 %762  ;;  %1104 = vpow2.f32 %v802_v2 }
 0x282   :  { %v808_v12 = vmul.f32 1.442695, %v788_v7  ;;  %v789_v13 = vsub.f32 %v1400_v23, %v1464_v8 }
 0x283   :  { %v1097_v14 = vpop.eup %1096  ;;  %v1468_v15 = vpop.xlane.xlu1 %772 }
 0x284   :  { %1106 = vpow2.f32 %v808_v12  ;;  %v794_v17 = vsub.f32 %v1404_v26, %v1468_v15  ;;  %836 = vadd.xlane.f32.xlu1 %v1097_v14  ;;  %v810_v19 = vmul.f32 1.442695, %v789_v13 }
 0x285   :  { %v1472_v18 = vpop.xlane.xlu0 %774  ;;  %1108 = vpow2.f32 %v814_v10 }
 0x286   :  { %v820_v21 = vmul.f32 1.442695, %v794_v17  ;;  %v795_v22 = vsub.f32 %v1408_v31, %v1472_v18 }
 0x287   :  { %v1099_v24 = vpop.eup %1098  ;;  %v1476_v25 = vpop.xlane.xlu1 %768 }
 0x288   :  { %1110 = vpow2.f32 %v820_v21  ;;  %v792_v27 = vsub.f32 %v1412_v34, %v1476_v25  ;;  %832 = vadd.xlane.f32.xlu1 %v1099_v24  ;;  %v822_v29 = vmul.f32 1.442695, %v795_v22 }
 0x289   :  { %v1480_v28 = vpop.xlane.xlu0 %770  ;;  %1112 = vpow2.f32 %v810_v19 }
 0x28a   :  { %v816_v30 = vmul.f32 1.442695, %v792_v27  ;;  %v793_v32 = vsub.f32 %v1416_v37, %v1480_v28 }
 0x28b   :  { %v1101_v33 = vpop.eup %1100  ;;  %v1484_v35 = vpop.xlane.xlu1 %776 }
 0x28c   :  { %1114 = vpow2.f32 %v816_v30  ;;  %v796_v36 = vsub.f32 %v1420_v42, %v1484_v35  ;;  %838 = vadd.xlane.f32.xlu0 %v1101_v33  ;;  %v818_v39 = vmul.f32 1.442695, %v793_v32 }
 0x28d   :  { %v1103_v38 = vpop.eup %1102  ;;  %1116 = vpow2.f32 %v822_v29 }
 0x28e   :  { %v824_v40 = vmul.f32 1.442695, %v796_v36  ;;  %844 = vadd.xlane.f32.xlu1 %v1103_v38  ;;  %v1105_v41 = vpop.eup %1104 }
 0x28f   :  { %v1488_v43 = vpop.xlane.xlu1 %780  ;;  %v1490_v44 = vpop.xlane.xlu0 %778 }
 0x290   :  { %1118 = vpow2.f32 %v824_v40  ;;  %v798_v45 = vsub.f32 %v1425_v46, %v1488_v43  ;;  %v797_v47 = vsub.f32 %v1428_v48, %v1490_v44  ;;  %834 = vadd.xlane.f32.xlu0 %v1105_v41 }
 0x291   :  { %v1107_v51 = vpop.eup %1106  ;;  %1120 = vpow2.f32 %v818_v39 }
 0x292   :  { %v828_v52 = vmul.f32 1.442695, %v798_v45  ;;  %v826_v54 = vmul.f32 1.442695, %v797_v47  ;;  %840 = vadd.xlane.f32.xlu1 %v1107_v51  ;;  %v1109_v57 = vpop.eup %1108 }
 0x293   :  { %v1496_v55 = vpop.xlane.xlu0 %782 }
 0x294   :  { %1122 = vpow2.f32 %v828_v52  ;;  %v799_v60 = vsub.f32 %v1433_v49, %v1496_v55  ;;  %846 = vadd.xlane.f32.xlu0 %v1109_v57 }
 0x295   :  { %v1111_v62 = vpop.eup %1110  ;;  %1124 = vpow2.f32 %v826_v54 }
 0x296   :  { %v830_v63 = vmul.f32 1.442695, %v799_v60  ;;  %852 = vadd.xlane.f32.xlu1 %v1111_v62  ;;  %v1113_v2 = vpop.eup %1112 }
 0x298   :  { %842 = vadd.xlane.f32.xlu0 %v1113_v2  ;;  %1126 = vpow2.f32 %v830_v63 }
 0x299   :  { %v1115_v3 = vpop.eup %1114 }
 0x29a   :  { %848 = vadd.xlane.f32.xlu1 %v1115_v3  ;;  %v1117_v4 = vpop.eup %1116 }
 0x29c   :  { %854 = vadd.xlane.f32.xlu0 %v1117_v4 }
 0x29d   :  { %v1119_v7 = vpop.eup %1118 }
 0x29e   :  { %856 = vadd.xlane.f32.xlu1 %v1119_v7  ;;  %v1121_v10 = vpop.eup %1120 }
 0x2a0   :  { %850 = vadd.xlane.f32.xlu0 %v1121_v10 }
 0x2a1   :  { %v1123_v12 = vpop.eup %1122 }
 0x2a2   :  { %860 = vadd.xlane.f32.xlu1 %v1123_v12  ;;  %v1125_v13 = vpop.eup %1124 }
 0x2a4   :  { %858 = vadd.xlane.f32.xlu0 %v1125_v13 }
 0x2a5   :  { %v1127_v14 = vpop.eup %1126 }
 0x2a8   :  { %862 = vadd.xlane.f32.xlu0 %v1127_v14 }
 0x30d   :  { %v837_v17 = vpop.xlane.xlu1 %836 }
 0x30e   :  { %1128 = vlog2.f32 %v837_v17 }
 0x311   :  { %v833_v19 = vpop.xlane.xlu1 %832 }
 0x312   :  { %1130 = vlog2.f32 %v833_v19 }
 0x315   :  { %v839_v21 = vpop.xlane.xlu0 %838 }
 0x316   :  { %1132 = vlog2.f32 %v839_v21 }
 0x317   :  { %v845_v22 = vpop.xlane.xlu1 %844 }
 0x318   :  { %1134 = vlog2.f32 %v845_v22 }
 0x319   :  { %v835_v24 = vpop.xlane.xlu0 %834 }
 0x31a   :  { %1136 = vlog2.f32 %v835_v24 }
 0x31b   :  { %v1129_v27 = vpop.eup %1128  ;;  %v841_v29 = vpop.xlane.xlu1 %840 }
 0x31c   :  { %v869_v30 = vmul.f32 0.6931472, %v1129_v27  ;;  %1138 = vlog2.f32 %v841_v29 }
 0x31d   :  { %v847_v32 = vpop.xlane.xlu0 %846 }
 0x31e   :  { %v898_v33 = vadd.f32 %v869_v30, %v1436_v50  ;;  %1140 = vlog2.f32 %v847_v32 }
 0x31f   :  { %v1131_v36 = vpop.eup %1130  ;;  %v853_v38 = vpop.xlane.xlu1 %852 }
 0x320   :  { %v914_v39 = vsub.f32 %v1373_v59, %v898_v33  ;;  %v865_v40 = vmul.f32 0.6931472, %v1131_v36  ;;  %1142 = vlog2.f32 %v853_v38 }
 0x321   :  { %v843_v41 = vpop.xlane.xlu0 %842 }
 0x322   :  { %930 = vst [vmem:[%s1586_s6 + $0x10] sm:$0xff] %v914_v39  ;;  %v896_v45 = vadd.f32 %v865_v40, %v1440_v53  ;;  %1144 = vlog2.f32 %v843_v41 }
 0x323   :  { %v1133_v47 = vpop.eup %1132  ;;  %v849_v51 = vpop.xlane.xlu1 %848 }
 0x324   :  { %v912_v52 = vsub.f32 %v1377_v0, %v896_v45  ;;  %v871_v50 = vmul.f32 0.6931472, %v1133_v47  ;;  %1146 = vlog2.f32 %v849_v51 }
 0x325   :  { %v1135_v54 = vpop.eup %1134  ;;  %v855_v57 = vpop.xlane.xlu0 %854 }
 0x326   :  { %928 = vst [vmem:[%s1586_s6] sm:$0xff] %v912_v52  ;;  %v899_v59 = vadd.f32 %v871_v50, %v1446_v58  ;;  %v877_v60 = vmul.f32 0.6931472, %v1135_v54  ;;  %1148 = vlog2.f32 %v855_v57 }
 0x327   :  { %v1137_v62 = vpop.eup %1136  ;;  %v857_v63 = vpop.xlane.xlu1 %856 }
 0x328   :  { %v915_v53 = vsub.f32 %v1384_v9, %v899_v59  ;;  %v902_v2 = vadd.f32 %v877_v60, %v1452_v61  ;;  %v867_v3 = vmul.f32 0.6931472, %v1137_v62  ;;  %1150 = vlog2.f32 %v857_v63 }
 0x329   :  { %v1139_v0 = vpop.eup %1138  ;;  %v851_v4 = vpop.xlane.xlu0 %850 }
 0x32a   :  { %931 = vst [vmem:[%s1586_s6 + $0x18] sm:$0xff] %v915_v53  ;;  %v918_v7 = vsub.f32 %v1388_v11, %v902_v2  ;;  %v897_v58 = vadd.f32 %v867_v3, %v1444_v56  ;;  %v873_v10 = vmul.f32 0.6931472, %v1139_v0  ;;  %1152 = vlog2.f32 %v851_v4 }
 0x32b   :  { %v1141_v12 = vpop.eup %1140  ;;  %v861_v13 = vpop.xlane.xlu1 %860 }
 0x32c   :  { %934 = vst [vmem:[%s1586_s6 + $0x30] sm:$0xff] %v918_v7  ;;  %v913_v9 = vsub.f32 %v1380_v5, %v897_v58  ;;  %v900_v61 = vadd.f32 %v873_v10, %v1460_v6  ;;  %v879_v14 = vmul.f32 0.6931472, %v1141_v12  ;;  %1154 = vlog2.f32 %v861_v13 }
 0x32d   :  { %v1143_v17 = vpop.eup %1142  ;;  %v859_v19 = vpop.xlane.xlu0 %858 }
 0x32e   :  { %929 = vst [vmem:[%s1586_s6 + $0x8] sm:$0xff] %v913_v9  ;;  %v916_v11 = vsub.f32 %v1396_v20, %v900_v61  ;;  %v903_v56 = vadd.f32 %v879_v14, %v1456_v1  ;;  %v885_v21 = vmul.f32 0.6931472, %v1143_v17  ;;  %1156 = vlog2.f32 %v859_v19 }
 0x32f   :  { %v1145_v22 = vpop.eup %1144 }
 0x330   :  { %932 = vst [vmem:[%s1586_s6 + $0x20] sm:$0xff] %v916_v11  ;;  %v919_v5 = vsub.f32 %v1392_v16, %v903_v56  ;;  %v906_v6 = vadd.f32 %v885_v21, %v1468_v15  ;;  %v875_v24 = vmul.f32 0.6931472, %v1145_v22 }
 0x331   :  { %v1147_v27 = vpop.eup %1146  ;;  %v863_v29 = vpop.xlane.xlu0 %862 }
 0x332   :  { %935 = vst [vmem:[%s1586_s6 + $0x38] sm:$0xff] %v919_v5  ;;  %v922_v20 = vsub.f32 %v1404_v26, %v906_v6  ;;  %v901_v1 = vadd.f32 %v875_v24, %v1464_v8  ;;  %v881_v30 = vmul.f32 0.6931472, %v1147_v27  ;;  %1158 = vlog2.f32 %v863_v29 }
 0x333   :  { %v1149_v32 = vpop.eup %1148 }
 0x334   :  { %938 = vst [vmem:[%s1586_s6 + $0x50] sm:$0xff] %v922_v20  ;;  %v917_v16 = vsub.f32 %v1400_v23, %v901_v1  ;;  %v904_v15 = vadd.f32 %v881_v30, %v1476_v25  ;;  %v887_v33 = vmul.f32 0.6931472, %v1149_v32 }
 0x335   :  { %v1151_v36 = vpop.eup %1150 }
 0x336   :  { %933 = vst [vmem:[%s1586_s6 + $0x28] sm:$0xff] %v917_v16  ;;  %v920_v26 = vsub.f32 %v1412_v34, %v904_v15  ;;  %v907_v8 = vadd.f32 %v887_v33, %v1472_v18  ;;  %v889_v38 = vmul.f32 0.6931472, %v1151_v36 }
 0x337   :  { %v1153_v39 = vpop.eup %1152 }
 0x338   :  { %936 = vst [vmem:[%s1586_s6 + $0x40] sm:$0xff] %v920_v26  ;;  %v923_v23 = vsub.f32 %v1408_v31, %v907_v8  ;;  %v908_v25 = vadd.f32 %v889_v38, %v1484_v35  ;;  %v883_v40 = vmul.f32 0.6931472, %v1153_v39 }
 0x339   :  { %v1155_v41 = vpop.eup %1154 }
 0x33a   :  { %939 = vst [vmem:[%s1586_s6 + $0x58] sm:$0xff] %v923_v23  ;;  %v924_v34 = vsub.f32 %v1420_v42, %v908_v25  ;;  %v905_v18 = vadd.f32 %v883_v40, %v1480_v28  ;;  %v893_v45 = vmul.f32 0.6931472, %v1155_v41 }
 0x33b   :  { %v1157_v47 = vpop.eup %1156 }
 0x33c   :  { %940 = vst [vmem:[%s1586_s6 + $0x60] sm:$0xff] %v924_v34  ;;  %v921_v31 = vsub.f32 %v1416_v37, %v905_v18  ;;  %v910_v35 = vadd.f32 %v893_v45, %v1488_v43  ;;  %v891_v51 = vmul.f32 0.6931472, %v1157_v47 }
 0x33e   :  { %937 = vst [vmem:[%s1586_s6 + $0x48] sm:$0xff] %v921_v31  ;;  %v926_v52 = vsub.f32 %v1425_v46, %v910_v35  ;;  %v909_v42 = vadd.f32 %v891_v51, %v1490_v44 }
 0x33f   :  { %v1159_v28 = vpop.eup %1158 }
 0x340   :  { %942 = vst [vmem:[%s1586_s6 + $0x70] sm:$0xff] %v926_v52  ;;  %v925_v50 = vsub.f32 %v1428_v48, %v909_v42  ;;  %v895_v54 = vmul.f32 0.6931472, %v1159_v28 }
 0x342   :  { %941 = vst [vmem:[%s1586_s6 + $0x68] sm:$0xff] %v925_v50  ;;  %v911_v37 = vadd.f32 %v895_v54, %v1496_v55 }
 0x344   :  { %v927_v43 = vsub.f32 %v1433_v49, %v911_v37 }
 0x346   :  { %943 = vst [vmem:[%s1586_s6 + $0x78] sm:$0xff] %v927_v43 }

</bundles_post_ra>
